<compile_context>
chip_gen: v5e
topology: v5e:2x2
jax: 0.10.0
libtpu: 0.0.40
codegen_flags: <defaults>
</compile_context>

<pallas_src>
import functools

import jax
import jax.numpy as jnp
import numpy as np
from jax import lax
from jax.experimental import pallas as pl
from jax.experimental.pallas import tpu as pltpu


# ----------------------------- fused kernel body ----------------------------

def _lenet_kernel(x_ref, u1_ref, u2_ref, w3_ref, w4_ref, o_ref, *, dims):
    """Whole LeNet forward for ONE batch element (grid axis = batch).

    x_ref : (1, 2, H//2, W*Cin)      even/odd-row-split, channels-last input
    u1_ref: (KH+1, W*Cin,  Wp1*C1)   conv1 + 2x2 avg-pool folded weights
    u2_ref: (KH+1, Wp1*C1, Wp2*C2)   conv2 + 2x2 avg-pool folded weights
    w3_ref: (Hp2*Wp2*C2, HID)        linear1 weights (flatten-order permuted)
    w4_ref: (HID, NUM_CLASSES)       linear2 weights
    o_ref : (1, 1, NUM_CLASSES)
    """
    kh, hp1, wp1c1, hp2, wp2c2, hid = dims

    # ---- conv1 + avgpool(2x2) folded: (KH+1) contiguous-slice matmuls ----
    acc1 = jnp.zeros((hp1, wp1c1), jnp.float32)
    for r in range(kh + 1):
        xs = x_ref[0, r % 2, r // 2:r // 2 + hp1, :]            # (Hp1, W*Cin)
        acc1 = acc1 + jnp.dot(xs, u1_ref[r],
                              preferred_element_type=jnp.float32)
    p1 = jnp.maximum(acc1 * 0.25, 0.0)                          # (Hp1, Wp1*C1)

    # ---- conv2 + avgpool(2x2) folded, feeding straight into linear1 ----
    hidden = jnp.zeros((1, hid), jnp.float32)
    for py in range(hp2):
        acc2 = jnp.zeros((1, wp2c2), jnp.float32)
        for r in range(kh + 1):
            acc2 = acc2 + jnp.dot(p1[2 * py + r:2 * py + r + 1, :], u2_ref[r],
                                  preferred_element_type=jnp.float32)
        f_py = jnp.maximum(acc2 * 0.25, 0.0)                    # (1, Wp2*C2)
        hidden = hidden + jnp.dot(f_py,
                                  w3_ref[py * wp2c2:(py + 1) * wp2c2, :],
                                  preferred_element_type=jnp.float32)

    h = jnp.maximum(hidden, 0.0)                                # (1, HID)
    o_ref[0] = jnp.dot(h, w4_ref[...], preferred_element_type=jnp.float32)


# ------------------- wrapper-side weight folding (tiny) ----------------------

def _fold_conv_pool(w, w_in):
    """Fold a VALID conv (torch OIHW weight, stride 1, no bias) followed by a
    2x2/stride-2 avg-pool (its summation part) into (KH+1) matrices.  Tap r of
    the result is contracted with channels-last input row (2*py + r) and
    accumulated to produce pooled output row py, columns ordered (px, cout)."""
    cout, cin, kh, kw = w.shape
    wo = w_in - kw + 1
    wp = wo // 2
    # sel[x, kj, px] = 1  iff  x == 2*px + b + kj for some b in {0, 1}
    sel = np.zeros((w_in, kw, wp), np.float32)
    for px in range(wp):
        for kj in range(kw):
            sel[2 * px + kj, kj, px] = 1.0
            sel[2 * px + 1 + kj, kj, px] = 1.0
    sel = jnp.asarray(sel)
    # T[ki, x, ci, px, co] = sum_kj sel[x, kj, px] * w[co, ci, ki, kj]
    t = jnp.einsum("xjp,oiyj->yxipo", sel, w)
    t = t.reshape(kh, w_in * cin, wp * cout)
    zero = jnp.zeros((1,) + t.shape[1:], t.dtype)
    # U[r] = T[r] + T[r-1]  (out-of-range taps are zero), r = 0..KH
    return jnp.concatenate([t, zero], 0) + jnp.concatenate([zero, t], 0)


# ------------------------------ LeNet forward --------------------------------

@jax.jit
def lenet_forward(params, x):
    """x: (N, Cin, H, W) float32 NCHW, same layout as the PyTorch module."""
    n, cin, h, w = x.shape
    w1, w2 = params["conv1_w"], params["conv2_w"]
    w3, w4 = params["linear1_w"], params["linear2_w"]
    c1, c2 = w1.shape[0], w2.shape[0]
    kh = w1.shape[2]
    hid, num_classes = w3.shape[0], w4.shape[0]

    ho1, wo1 = h - kh + 1, w - kh + 1
    hp1, wp1 = ho1 // 2, wo1 // 2
    ho2, wo2 = hp1 - kh + 1, wp1 - kh + 1
    hp2, wp2 = ho2 // 2, wo2 // 2
    feat = hp2 * wp2 * c2
    assert ho1 % 2 == 0 and wo1 % 2 == 0 and ho2 % 2 == 0 and wo2 % 2 == 0
    assert w3.shape[1] == feat and w4.shape[1] == hid

    # --- layout glue at the public NCHW boundary (tiny wrapper-side XLA) ---
    x_cl = jnp.transpose(x, (0, 2, 3, 1)).reshape(n, h, w * cin)
    x_split = x_cl.reshape(n, h // 2, 2, w * cin).transpose(0, 2, 1, 3)

    # --- fold conv+pool into matmul weights; permute linear1 rows so the
    #     kernel's channels-last (py, px, c) flatten matches torch's (c, py, px)
    u1 = _fold_conv_pool(w1, w)            # (KH+1, W*Cin,  Wp1*C1)
    u2 = _fold_conv_pool(w2, wp1)          # (KH+1, Wp1*C1, Wp2*C2)
    w3k = w3.reshape(hid, c2, hp2, wp2).transpose(2, 3, 1, 0).reshape(feat, hid)
    w4k = w4.T                             # (HID, NUM_CLASSES)

    dims = (kh, hp1, wp1 * c1, hp2, wp2 * c2, hid)
    kernel = functools.partial(_lenet_kernel, dims=dims)

    out = pl.pallas_call(
        kernel,
        out_shape=jax.ShapeDtypeStruct((n, 1, num_classes), jnp.float32),
        grid=(n,),
        in_specs=[
            pl.BlockSpec((1, 2, h // 2, w * cin), lambda i: (i, 0, 0, 0)),
            pl.BlockSpec((kh + 1, w * cin, wp1 * c1), lambda i: (0, 0, 0)),
            pl.BlockSpec((kh + 1, wp1 * c1, wp2 * c2), lambda i: (0, 0, 0)),
            pl.BlockSpec((feat, hid), lambda i: (0, 0)),
            pl.BlockSpec((hid, num_classes), lambda i: (0, 0)),
        ],
        out_specs=pl.BlockSpec((1, 1, num_classes), lambda i: (i, 0, 0)),
        compiler_params=pltpu.CompilerParams(
            dimension_semantics=("parallel",)),
    )(x_split, u1, u2, w3k, w4k)
    return out.reshape(n, num_classes)


# --------------------------- params & pure-JAX reference ---------------------

def lenet_init(key, input_shape, num_classes):
    """input_shape = (H, W, C) as in the PyTorch module; bias=False everywhere."""
    h, w, c = input_shape
    flatten_features = 64 * ((h - 4) // 2 - 4) // 2 * ((w - 4) // 2 - 4) // 2
    k1, k2, k3, k4 = jax.random.split(key, 4)
    return {
        "conv1_w": jax.random.normal(k1, (16, c, 5, 5), jnp.float32) * 0.05,
        "conv2_w": jax.random.normal(k2, (64, 16, 5, 5), jnp.float32) * 0.05,
        "linear1_w": jax.random.normal(k3, (128, flatten_features), jnp.float32) * 0.05,
        "linear2_w": jax.random.normal(k4, (num_classes, 128), jnp.float32) * 0.05,
    }


def _lenet_reference(params, x):
    def conv(inp, w):
        return lax.conv_general_dilated(
            inp, w, window_strides=(1, 1), padding="VALID",
            dimension_numbers=("NCHW", "OIHW", "NCHW"))

    def pool_relu(y):
        n, c, hh, ww = y.shape
        p = y.reshape(n, c, hh // 2, 2, ww // 2, 2).mean(axis=(3, 5))
        return jnp.maximum(p, 0.0)

    y = pool_relu(conv(x, params["conv1_w"]))
    y = pool_relu(conv(y, params["conv2_w"]))
    f = y.reshape(y.shape[0], -1)
    h1 = jnp.maximum(f @ params["linear1_w"].T, 0.0)
    return h1 @ params["linear2_w"].T


# ----------------------------------- main ------------------------------------

if __name__ == "__main__":
    key = jax.random.PRNGKey(0)
    kx, kp = jax.random.split(key)

    input_shape = (16, 16, 3)   # (H, W, C) as in the PyTorch module
    num_classes = 10
    batch = 2

    x = jax.random.normal(
        kx, (batch, input_shape[2], input_shape[0], input_shape[1]), jnp.float32)
    params = lenet_init(kp, input_shape, num_classes)

    out = jax.block_until_ready(lenet_forward(params, x))
    assert out.shape == (batch, num_classes), out.shape

    ref = jax.block_until_ready(_lenet_reference(params, x))
    np.testing.assert_allclose(np.asarray(out), np.asarray(ref),
                               rtol=1e-3, atol=1e-4)
    print("KERNEL_OK")
</pallas_src>

<mosaic_0001>
module attributes {stable_mosaic.version = 11 : i64} {
  func.func @_lenet_kernel(%arg0: i32, %arg1: memref<1x2x8x48xf32, #tpu.memory_space<vmem>>, %arg2: memref<6x48x96xf32, #tpu.memory_space<vmem>>, %arg3: memref<6x96x64xf32, #tpu.memory_space<vmem>>, %arg4: memref<64x128xf32, #tpu.memory_space<vmem>>, %arg5: memref<128x10xf32, #tpu.memory_space<vmem>>, %arg6: memref<1x1x10xf32, #tpu.memory_space<vmem>>) attributes {dimension_semantics = [#tpu.dimension_semantics<parallel>], iteration_bounds = array<i64: 2>, scalar_prefetch = 0 : i64, scratch_operands = 0 : i64, tpu.core_type = #tpu.core_type<tc>, window_params = [{transform_indices = @transform_0, window_bounds = array<i64: 1, 2, 8, 48>}, {pipeline_mode = #tpu.pipeline_mode<synchronous>, transform_indices = @transform_1, window_bounds = array<i64: 6, 48, 96>}, {pipeline_mode = #tpu.pipeline_mode<synchronous>, transform_indices = @transform_2, window_bounds = array<i64: 6, 96, 64>}, {pipeline_mode = #tpu.pipeline_mode<synchronous>, transform_indices = @transform_3, window_bounds = array<i64: 64, 128>}, {pipeline_mode = #tpu.pipeline_mode<synchronous>, transform_indices = @transform_4, window_bounds = array<i64: 128, 10>}, {transform_indices = @transform_5, window_bounds = array<i64: 1, 1, 10>}]} {
    %cst = arith.constant 0.000000e+00 : f32
    %0 = vector.broadcast %cst : f32 to vector<6x96xf32>
    %c0 = arith.constant 0 : index
    %c0_0 = arith.constant 0 : index
    %c0_1 = arith.constant 0 : index
    %c0_2 = arith.constant 0 : index
    %1 = vector.load %arg1[%c0, %c0_0, %c0_1, %c0_2] : memref<1x2x8x48xf32, #tpu.memory_space<vmem>>, vector<1x1x6x48xf32>
    %2 = vector.shape_cast %1 : vector<1x1x6x48xf32> to vector<6x48xf32>
    %c0_3 = arith.constant 0 : index
    %c0_4 = arith.constant 0 : index
    %c0_5 = arith.constant 0 : index
    %3 = vector.load %arg2[%c0_3, %c0_4, %c0_5] : memref<6x48x96xf32, #tpu.memory_space<vmem>>, vector<1x48x96xf32>
    %4 = vector.shape_cast %3 : vector<1x48x96xf32> to vector<48x96xf32>
    %cst_6 = arith.constant dense<0.000000e+00> : vector<6x96xf32>
    %5 = tpu.matmul %2, %4, %cst_6 {dimension_numbers = #tpu.dot_dimension_numbers<[1], [0], [0], [1], [0, 0, 1, 1], [], []>} : vector<6x48xf32>, vector<48x96xf32>, vector<6x96xf32> -> vector<6x96xf32>
    %6 = arith.addf %0, %5 : vector<6x96xf32>
    %c0_7 = arith.constant 0 : index
    %c1 = arith.constant 1 : index
    %c0_8 = arith.constant 0 : index
    %c0_9 = arith.constant 0 : index
    %7 = vector.load %arg1[%c0_7, %c1, %c0_8, %c0_9] : memref<1x2x8x48xf32, #tpu.memory_space<vmem>>, vector<1x1x6x48xf32>
    %8 = vector.shape_cast %7 : vector<1x1x6x48xf32> to vector<6x48xf32>
    %c1_10 = arith.constant 1 : index
    %c0_11 = arith.constant 0 : index
    %c0_12 = arith.constant 0 : index
    %9 = vector.load %arg2[%c1_10, %c0_11, %c0_12] : memref<6x48x96xf32, #tpu.memory_space<vmem>>, vector<1x48x96xf32>
    %10 = vector.shape_cast %9 : vector<1x48x96xf32> to vector<48x96xf32>
    %cst_13 = arith.constant dense<0.000000e+00> : vector<6x96xf32>
    %11 = tpu.matmul %8, %10, %cst_13 {dimension_numbers = #tpu.dot_dimension_numbers<[1], [0], [0], [1], [0, 0, 1, 1], [], []>} : vector<6x48xf32>, vector<48x96xf32>, vector<6x96xf32> -> vector<6x96xf32>
    %12 = arith.addf %6, %11 : vector<6x96xf32>
    %c0_14 = arith.constant 0 : index
    %c0_15 = arith.constant 0 : index
    %c1_16 = arith.constant 1 : index
    %c0_17 = arith.constant 0 : index
    %13 = vector.load %arg1[%c0_14, %c0_15, %c1_16, %c0_17] : memref<1x2x8x48xf32, #tpu.memory_space<vmem>>, vector<1x1x6x48xf32>
    %14 = vector.shape_cast %13 : vector<1x1x6x48xf32> to vector<6x48xf32>
    %c2 = arith.constant 2 : index
    %c0_18 = arith.constant 0 : index
    %c0_19 = arith.constant 0 : index
    %15 = vector.load %arg2[%c2, %c0_18, %c0_19] : memref<6x48x96xf32, #tpu.memory_space<vmem>>, vector<1x48x96xf32>
    %16 = vector.shape_cast %15 : vector<1x48x96xf32> to vector<48x96xf32>
    %cst_20 = arith.constant dense<0.000000e+00> : vector<6x96xf32>
    %17 = tpu.matmul %14, %16, %cst_20 {dimension_numbers = #tpu.dot_dimension_numbers<[1], [0], [0], [1], [0, 0, 1, 1], [], []>} : vector<6x48xf32>, vector<48x96xf32>, vector<6x96xf32> -> vector<6x96xf32>
    %18 = arith.addf %12, %17 : vector<6x96xf32>
    %c0_21 = arith.constant 0 : index
    %c1_22 = arith.constant 1 : index
    %c1_23 = arith.constant 1 : index
    %c0_24 = arith.constant 0 : index
    %19 = vector.load %arg1[%c0_21, %c1_22, %c1_23, %c0_24] : memref<1x2x8x48xf32, #tpu.memory_space<vmem>>, vector<1x1x6x48xf32>
    %20 = vector.shape_cast %19 : vector<1x1x6x48xf32> to vector<6x48xf32>
    %c3 = arith.constant 3 : index
    %c0_25 = arith.constant 0 : index
    %c0_26 = arith.constant 0 : index
    %21 = vector.load %arg2[%c3, %c0_25, %c0_26] : memref<6x48x96xf32, #tpu.memory_space<vmem>>, vector<1x48x96xf32>
    %22 = vector.shape_cast %21 : vector<1x48x96xf32> to vector<48x96xf32>
    %cst_27 = arith.constant dense<0.000000e+00> : vector<6x96xf32>
    %23 = tpu.matmul %20, %22, %cst_27 {dimension_numbers = #tpu.dot_dimension_numbers<[1], [0], [0], [1], [0, 0, 1, 1], [], []>} : vector<6x48xf32>, vector<48x96xf32>, vector<6x96xf32> -> vector<6x96xf32>
    %24 = arith.addf %18, %23 : vector<6x96xf32>
    %c0_28 = arith.constant 0 : index
    %c0_29 = arith.constant 0 : index
    %c2_30 = arith.constant 2 : index
    %c0_31 = arith.constant 0 : index
    %25 = vector.load %arg1[%c0_28, %c0_29, %c2_30, %c0_31] : memref<1x2x8x48xf32, #tpu.memory_space<vmem>>, vector<1x1x6x48xf32>
    %26 = vector.shape_cast %25 : vector<1x1x6x48xf32> to vector<6x48xf32>
    %c4 = arith.constant 4 : index
    %c0_32 = arith.constant 0 : index
    %c0_33 = arith.constant 0 : index
    %27 = vector.load %arg2[%c4, %c0_32, %c0_33] : memref<6x48x96xf32, #tpu.memory_space<vmem>>, vector<1x48x96xf32>
    %28 = vector.shape_cast %27 : vector<1x48x96xf32> to vector<48x96xf32>
    %cst_34 = arith.constant dense<0.000000e+00> : vector<6x96xf32>
    %29 = tpu.matmul %26, %28, %cst_34 {dimension_numbers = #tpu.dot_dimension_numbers<[1], [0], [0], [1], [0, 0, 1, 1], [], []>} : vector<6x48xf32>, vector<48x96xf32>, vector<6x96xf32> -> vector<6x96xf32>
    %30 = arith.addf %24, %29 : vector<6x96xf32>
    %c0_35 = arith.constant 0 : index
    %c1_36 = arith.constant 1 : index
    %c2_37 = arith.constant 2 : index
    %c0_38 = arith.constant 0 : index
    %31 = vector.load %arg1[%c0_35, %c1_36, %c2_37, %c0_38] : memref<1x2x8x48xf32, #tpu.memory_space<vmem>>, vector<1x1x6x48xf32>
    %32 = vector.shape_cast %31 : vector<1x1x6x48xf32> to vector<6x48xf32>
    %c5 = arith.constant 5 : index
    %c0_39 = arith.constant 0 : index
    %c0_40 = arith.constant 0 : index
    %33 = vector.load %arg2[%c5, %c0_39, %c0_40] : memref<6x48x96xf32, #tpu.memory_space<vmem>>, vector<1x48x96xf32>
    %34 = vector.shape_cast %33 : vector<1x48x96xf32> to vector<48x96xf32>
    %cst_41 = arith.constant dense<0.000000e+00> : vector<6x96xf32>
    %35 = tpu.matmul %32, %34, %cst_41 {dimension_numbers = #tpu.dot_dimension_numbers<[1], [0], [0], [1], [0, 0, 1, 1], [], []>} : vector<6x48xf32>, vector<48x96xf32>, vector<6x96xf32> -> vector<6x96xf32>
    %36 = arith.addf %30, %35 : vector<6x96xf32>
    %cst_42 = arith.constant 2.500000e-01 : f32
    %37 = vector.broadcast %cst_42 : f32 to vector<6x96xf32>
    %38 = arith.mulf %36, %37 : vector<6x96xf32>
    %cst_43 = arith.constant 0.000000e+00 : f32
    %39 = vector.broadcast %cst_43 : f32 to vector<6x96xf32>
    %40 = arith.maximumf %38, %39 : vector<6x96xf32>
    %cst_44 = arith.constant 0.000000e+00 : f32
    %41 = vector.broadcast %cst_44 : f32 to vector<1x128xf32>
    %cst_45 = arith.constant 0.000000e+00 : f32
    %42 = vector.broadcast %cst_45 : f32 to vector<1x64xf32>
    %43 = vector.extract_strided_slice %40 {offsets = [0, 0], sizes = [1, 96], strides = [1, 1]} : vector<6x96xf32> to vector<1x96xf32>
    %c0_46 = arith.constant 0 : index
    %c0_47 = arith.constant 0 : index
    %c0_48 = arith.constant 0 : index
    %44 = vector.load %arg3[%c0_46, %c0_47, %c0_48] : memref<6x96x64xf32, #tpu.memory_space<vmem>>, vector<1x96x64xf32>
    %45 = vector.shape_cast %44 : vector<1x96x64xf32> to vector<96x64xf32>
    %cst_49 = arith.constant dense<0.000000e+00> : vector<1x64xf32>
    %46 = tpu.matmul %43, %45, %cst_49 {dimension_numbers = #tpu.dot_dimension_numbers<[1], [0], [0], [1], [0, 0, 1, 1], [], []>} : vector<1x96xf32>, vector<96x64xf32>, vector<1x64xf32> -> vector<1x64xf32>
    %47 = arith.addf %42, %46 : vector<1x64xf32>
    %48 = vector.extract_strided_slice %40 {offsets = [1, 0], sizes = [1, 96], strides = [1, 1]} : vector<6x96xf32> to vector<1x96xf32>
    %c1_50 = arith.constant 1 : index
    %c0_51 = arith.constant 0 : index
    %c0_52 = arith.constant 0 : index
    %49 = vector.load %arg3[%c1_50, %c0_51, %c0_52] : memref<6x96x64xf32, #tpu.memory_space<vmem>>, vector<1x96x64xf32>
    %50 = vector.shape_cast %49 : vector<1x96x64xf32> to vector<96x64xf32>
    %cst_53 = arith.constant dense<0.000000e+00> : vector<1x64xf32>
    %51 = tpu.matmul %48, %50, %cst_53 {dimension_numbers = #tpu.dot_dimension_numbers<[1], [0], [0], [1], [0, 0, 1, 1], [], []>} : vector<1x96xf32>, vector<96x64xf32>, vector<1x64xf32> -> vector<1x64xf32>
    %52 = arith.addf %47, %51 : vector<1x64xf32>
    %53 = vector.extract_strided_slice %40 {offsets = [2, 0], sizes = [1, 96], strides = [1, 1]} : vector<6x96xf32> to vector<1x96xf32>
    %c2_54 = arith.constant 2 : index
    %c0_55 = arith.constant 0 : index
    %c0_56 = arith.constant 0 : index
    %54 = vector.load %arg3[%c2_54, %c0_55, %c0_56] : memref<6x96x64xf32, #tpu.memory_space<vmem>>, vector<1x96x64xf32>
    %55 = vector.shape_cast %54 : vector<1x96x64xf32> to vector<96x64xf32>
    %cst_57 = arith.constant dense<0.000000e+00> : vector<1x64xf32>
    %56 = tpu.matmul %53, %55, %cst_57 {dimension_numbers = #tpu.dot_dimension_numbers<[1], [0], [0], [1], [0, 0, 1, 1], [], []>} : vector<1x96xf32>, vector<96x64xf32>, vector<1x64xf32> -> vector<1x64xf32>
    %57 = arith.addf %52, %56 : vector<1x64xf32>
    %58 = vector.extract_strided_slice %40 {offsets = [3, 0], sizes = [1, 96], strides = [1, 1]} : vector<6x96xf32> to vector<1x96xf32>
    %c3_58 = arith.constant 3 : index
    %c0_59 = arith.constant 0 : index
    %c0_60 = arith.constant 0 : index
    %59 = vector.load %arg3[%c3_58, %c0_59, %c0_60] : memref<6x96x64xf32, #tpu.memory_space<vmem>>, vector<1x96x64xf32>
    %60 = vector.shape_cast %59 : vector<1x96x64xf32> to vector<96x64xf32>
    %cst_61 = arith.constant dense<0.000000e+00> : vector<1x64xf32>
    %61 = tpu.matmul %58, %60, %cst_61 {dimension_numbers = #tpu.dot_dimension_numbers<[1], [0], [0], [1], [0, 0, 1, 1], [], []>} : vector<1x96xf32>, vector<96x64xf32>, vector<1x64xf32> -> vector<1x64xf32>
    %62 = arith.addf %57, %61 : vector<1x64xf32>
    %63 = vector.extract_strided_slice %40 {offsets = [4, 0], sizes = [1, 96], strides = [1, 1]} : vector<6x96xf32> to vector<1x96xf32>
    %c4_62 = arith.constant 4 : index
    %c0_63 = arith.constant 0 : index
    %c0_64 = arith.constant 0 : index
    %64 = vector.load %arg3[%c4_62, %c0_63, %c0_64] : memref<6x96x64xf32, #tpu.memory_space<vmem>>, vector<1x96x64xf32>
    %65 = vector.shape_cast %64 : vector<1x96x64xf32> to vector<96x64xf32>
    %cst_65 = arith.constant dense<0.000000e+00> : vector<1x64xf32>
    %66 = tpu.matmul %63, %65, %cst_65 {dimension_numbers = #tpu.dot_dimension_numbers<[1], [0], [0], [1], [0, 0, 1, 1], [], []>} : vector<1x96xf32>, vector<96x64xf32>, vector<1x64xf32> -> vector<1x64xf32>
    %67 = arith.addf %62, %66 : vector<1x64xf32>
    %68 = vector.extract_strided_slice %40 {offsets = [5, 0], sizes = [1, 96], strides = [1, 1]} : vector<6x96xf32> to vector<1x96xf32>
    %c5_66 = arith.constant 5 : index
    %c0_67 = arith.constant 0 : index
    %c0_68 = arith.constant 0 : index
    %69 = vector.load %arg3[%c5_66, %c0_67, %c0_68] : memref<6x96x64xf32, #tpu.memory_space<vmem>>, vector<1x96x64xf32>
    %70 = vector.shape_cast %69 : vector<1x96x64xf32> to vector<96x64xf32>
    %cst_69 = arith.constant dense<0.000000e+00> : vector<1x64xf32>
    %71 = tpu.matmul %68, %70, %cst_69 {dimension_numbers = #tpu.dot_dimension_numbers<[1], [0], [0], [1], [0, 0, 1, 1], [], []>} : vector<1x96xf32>, vector<96x64xf32>, vector<1x64xf32> -> vector<1x64xf32>
    %72 = arith.addf %67, %71 : vector<1x64xf32>
    %cst_70 = arith.constant 2.500000e-01 : f32
    %73 = vector.broadcast %cst_70 : f32 to vector<1x64xf32>
    %74 = arith.mulf %72, %73 : vector<1x64xf32>
    %cst_71 = arith.constant 0.000000e+00 : f32
    %75 = vector.broadcast %cst_71 : f32 to vector<1x64xf32>
    %76 = arith.maximumf %74, %75 : vector<1x64xf32>
    %c0_72 = arith.constant 0 : index
    %c0_73 = arith.constant 0 : index
    %77 = vector.load %arg4[%c0_72, %c0_73] : memref<64x128xf32, #tpu.memory_space<vmem>>, vector<64x128xf32>
    %cst_74 = arith.constant dense<0.000000e+00> : vector<1x128xf32>
    %78 = tpu.matmul %76, %77, %cst_74 {dimension_numbers = #tpu.dot_dimension_numbers<[1], [0], [0], [1], [0, 0, 1, 1], [], []>} : vector<1x64xf32>, vector<64x128xf32>, vector<1x128xf32> -> vector<1x128xf32>
    %79 = arith.addf %41, %78 : vector<1x128xf32>
    %cst_75 = arith.constant 0.000000e+00 : f32
    %80 = vector.broadcast %cst_75 : f32 to vector<1x128xf32>
    %81 = arith.maximumf %79, %80 : vector<1x128xf32>
    %c0_76 = arith.constant 0 : index
    %c0_77 = arith.constant 0 : index
    %82 = vector.load %arg5[%c0_76, %c0_77] : memref<128x10xf32, #tpu.memory_space<vmem>>, vector<128x10xf32>
    %cst_78 = arith.constant dense<0.000000e+00> : vector<1x10xf32>
    %83 = tpu.matmul %81, %82, %cst_78 {dimension_numbers = #tpu.dot_dimension_numbers<[1], [0], [0], [1], [0, 0, 1, 1], [], []>} : vector<1x128xf32>, vector<128x10xf32>, vector<1x10xf32> -> vector<1x10xf32>
    %c0_79 = arith.constant 0 : index
    %c0_80 = arith.constant 0 : index
    %c0_81 = arith.constant 0 : index
    %84 = vector.load %arg6[%c0_79, %c0_80, %c0_81] : memref<1x1x10xf32, #tpu.memory_space<vmem>>, vector<1x1x10xf32>
    %85 = vector.shape_cast %84 : vector<1x1x10xf32> to vector<1x10xf32>
    %86 = vector.shape_cast %83 : vector<1x10xf32> to vector<1x1x10xf32>
    tpu.vector_store %arg6[%c0_79, %c0_80, %c0_81], %86 {strides = array<i32>} : memref<1x1x10xf32, #tpu.memory_space<vmem>>, vector<1x1x10xf32>,
    return
  }
  func.func @transform_0(%arg0: i32) -> (i32, i32, i32, i32) {
    %c0_i32 = arith.constant 0 : i32
    %c0_i32_0 = arith.constant 0 : i32
    %c0_i32_1 = arith.constant 0 : i32
    %c0_i32_2 = arith.constant 0 : i32
    return %arg0, %c0_i32, %c0_i32_0, %c0_i32_1 : i32, i32, i32, i32
  }
  func.func @transform_1(%arg0: i32) -> (i32, i32, i32) {
    %c0_i32 = arith.constant 0 : i32
    %c0_i32_0 = arith.constant 0 : i32
    %c0_i32_1 = arith.constant 0 : i32
    %c0_i32_2 = arith.constant 0 : i32
    return %c0_i32, %c0_i32_0, %c0_i32_1 : i32, i32, i32
  }
  func.func @transform_2(%arg0: i32) -> (i32, i32, i32) {
    %c0_i32 = arith.constant 0 : i32
    %c0_i32_0 = arith.constant 0 : i32
    %c0_i32_1 = arith.constant 0 : i32
    %c0_i32_2 = arith.constant 0 : i32
    return %c0_i32, %c0_i32_0, %c0_i32_1 : i32, i32, i32
  }
  func.func @transform_3(%arg0: i32) -> (i32, i32) {
    %c0_i32 = arith.constant 0 : i32
    %c0_i32_0 = arith.constant 0 : i32
    %c0_i32_1 = arith.constant 0 : i32
    return %c0_i32, %c0_i32_0 : i32, i32
  }
  func.func @transform_4(%arg0: i32) -> (i32, i32) {
    %c0_i32 = arith.constant 0 : i32
    %c0_i32_0 = arith.constant 0 : i32
    %c0_i32_1 = arith.constant 0 : i32
    return %c0_i32, %c0_i32_0 : i32, i32
  }
  func.func @transform_5(%arg0: i32) -> (i32, i32, i32) {
    %c0_i32 = arith.constant 0 : i32
    %c0_i32_0 = arith.constant 0 : i32
    %c0_i32_1 = arith.constant 0 : i32
    return %arg0, %c0_i32, %c0_i32_0 : i32, i32, i32
  }
}

</mosaic_0001>

<bundles_post_ra>
// kernel: lenet_forward.1
= control target key start
LH: loop header
LB: loop body
LE: loop exit
PB: predicated region body
PF: predicated region fallthrough
CT: control target
= control target key end

     0   :  { %10 = vsyncpa [#allocation3], 0  ;;  %s1519_s0 = inlined_call_operand.vmem [shape: f32[2,2,8,48], index: 0, kind: input, shape index: {}]   ;;  %s1520_s1 = inlined_call_operand.vmem [shape: f32[6,48,96], index: 1, kind: input, shape index: {}]   ;;  %s1521_s2 = inlined_call_operand.vmem [shape: f32[6,96,64], index: 2, kind: input, shape index: {}]   ;;  %s1522_s3 = inlined_call_operand.vmem [shape: f32[64,128], index: 3, kind: input, shape index: {}]   ;;  %s1523_s4 = inlined_call_operand.vmem [shape: f32[128,10], index: 4, kind: input, shape index: {}]   ;;  %s1524_s5 = inlined_call_operand.hbm [shape: f32[2,1,10], index: 5, kind: output, shape index: {}]  }
   0x1   :  { %12 = vsyncpa [#allocation3 + $0x1], 0  ;;  %s1024_s18 = smov 0   ;;  %s1026_s19 = smov 0  }
   0x2   :  { %s1028_s20 = smov 0   ;;  %s1030_s21 = smov 0  }
   0x3 LB: > { %s1045_s22 = sadd.s32 4294967295, %s992_s21   ;;  %s776_s23 = sadd.s32 4294967294, %s992_s21   ;;  %s992_s21 = sphi %s1030_s21, %s1530_s21   ;;  %s988_s20 = sphi %s1028_s20, %s1529_s20   ;;  %s984_s19 = sphi %s1026_s19, %s1528_s19   ;;  %s980_s18 = sphi %s1024_s18, %s1527_s18  }
   0x4   : > { %s1049_s24 = sadd.s32 1, %s992_s21   ;;  %s135_s25 = sadd.s32 1, %s988_s20 }
   0x5   : > { %s132_s26 = ssub.s32 %s992_s21, %s1049_s24  ;;  %p145_p0 = scmp.ne.s32.totalorder %s988_s20, %s984_s19 }
   0x6   : > { %p133_p1 = scmp.eq.s32.totalorder %s132_s26, 0  ;;  %p146_p2 = scmp.eq.s32.totalorder %s1045_s22, 1 }
   0x7   : > { %p151_p3 = scmp.ne.s32.totalorder %s984_s19, %s980_s18  ;;  %p152_p4 = scmp.eq.s32.totalorder %s776_s23, 1 }
   0x8   : > { %s1060_s27 = scalar_select %p133_p1, %s988_s20, %s135_s25  }
   0x9   : > { %p1062_p5 = por %p146_p2, %p145_p0  ;;  %p1066_p6 = por %p152_p4, %p151_p3 }
   0xa   : > { %p779_p7 = scmp.ge.s32.totalorder %s992_s21, 1  ;;  %p190_p8 = scmp.lt.s32.totalorder %s992_s21, 3 }
   0xc   : > { %p191_p9 = pnand %p779_p7, %p190_p8 }
   0xd   : > { %p217_p10 = scmp.lt.s32.totalorder (!%p191_p9), %s1045_s22, 1  ;;  %s215_s30 = sand.u32 (!%p191_p9), 1, %s984_s19  }
   0xe   : > { %194 = sbr.rel (%p191_p9) target bundleno = 594 (0x252), region = 40  ;;  %s717_s9 = scalar_lea.hbm (!%p191_p9), %s1524_s5, %s1045_s22 }
   0xf   : > { %s721_s11 = sshll.u32 (!%p191_p9), %s717_s9, 4  ;;  %s709_s12 = scalar_lea.sflag (!%p191_p9), [#allocation3], %s215_s30  ;;  %s722_s11 = int_to_ptr.hbm [resolvable:$true] %s721_s11 }
  0x10   : > { %s944_s13 = sshra.s32 (!%p191_p9), %s722_s11, 4  ;;  %s945_s13 = int_to_ptr.hbm [resolvable:$true] %s944_s13 }
  0x11   : > { %s946_s14 = scalar_lea.hbm (!%p191_p9), %s945_s13, 1  ;;  %p951_p0 = scmp.lt.s32.totalorder (!%p191_p9), %s945_s13, %s1524_s5 }
  0x12   : > { %p947_p11 = scmp.ne.s32.totalorder (!%p191_p9), %s945_s13, %s946_s14 }
  0x13   : > { %v228_v0 = vld [vmem:[%s1520_s1 + $0x28] sm:$0xff]  ;;  %v227_v1 = vld [vmem:[%s1520_s1 + $0x20] sm:$0xff]  ;;  %v788_v2 = vld [vmem:[%s1520_s1 + $0x58] sm:$0xff]  ;;  %s218_s15 = scalar_select %p217_p10, %s1045_s22, 1  ;;  %vm238_vm0 = vcmask 392192   ;;  %vm442_vm1 = vcmask 785408  }
  0x14   : > { %275 = vmatpush.msra.mxu2 %v228_v0  ;;  %v226_v3 = vld [vmem:[%s1520_s1 + $0x18] sm:$0xff]  ;;  %252 = vmatpush.msra.mxu0 %v788_v2  ;;  %v787_v4 = vld [vmem:[%s1520_s1 + $0x50] sm:$0xff]  ;;  %v786_v5 = vld [vmem:[%s1520_s1 + $0x48] sm:$0xff]  ;;  %vm645_vm2 = vcmask 523264   ;;  %vm706_vm3 = vcmask 73728   ;;  %p948_p12 = pnand %p947_p11, %p1062_p5  ;;  %s950_s22 = scalar_lea.hbm %s1524_s5, 2 }
  0x15   : > { %v804_v6 = vld [vmem:[%s1520_s1 + $0xb8] sm:$0xff]  ;;  %v225_v7 = vld [vmem:[%s1520_s1 + $0x10] sm:$0xff]  ;;  %s890_s6 = sshll.u32 %s218_s15, 4  ;;  %v785_v9 = vld [vmem:[%s1520_s1 + $0x40] sm:$0xff]  ;;  %p952_p1 = scmp.lt.s32.totalorder %s950_s22, %s946_s14 }
  0x16   : > { %276 = vmatpush.msra.mxu2 %v227_v1  ;;  %253 = vmatpush.msra.mxu0 %v787_v4  ;;  %v803_v8 = vld [vmem:[%s1520_s1 + $0xb0] sm:$0xff]  ;;  %v802_v10 = vld [vmem:[%s1520_s1 + $0xa8] sm:$0xff]  ;;  %s1113_s17 = scalar_lea.vmem %s1519_s0, %s890_s6  ;;  %v784_v12 = vld [vmem:[%s1520_s1 + $0x38] sm:$0xff]  ;;  %s216_s6 = scalar_lea.vmem [#allocation2], %s215_s30 }
  0x17   : > { %338 = vmatpush.msra.mxu3 %v804_v6  ;;  %v224_v11 = vld [vmem:[%s1520_s1 + $0x8] sm:$0xff]  ;;  %v801_v13 = vld [vmem:[%s1520_s1 + $0xa0] sm:$0xff]  ;;  %v783_v16 = vld [vmem:[%s1520_s1 + $0x30] sm:$0xff]  ;;  %s719_s10 = sshll.u32 %s216_s6, 4  ;;  %p949_p13 = pneg %p948_p12  ;;  %s720_s10 = int_to_ptr.vmem [resolvable:$true] %s719_s10 }
  0x18   : > { %277 = vmatpush.msra.mxu2 %v226_v3  ;;  %254 = vmatpush.msra.mxu0 %v786_v5  ;;  %v223_v14 = vld [vmem:[%s1520_s1] sm:$0xff]  ;;  %v796_v15 = vld [vmem:[%s1520_s1 + $0x88] sm:$0xff]  ;;  %v819_v17 = vld [vmem:[%s1520_s1 + $0x118] sm:$0xff]  ;;  %p953_p2 = por %p952_p1, %p951_p0 }
  0x19   : > { %339 = vmatpush.msra.mxu3 %v803_v8  ;;  %v222_v18 = vld [vmem:[%s1113_s17] sm:$0x3f]  ;;  %v782_v19 = vld [vmem:[%s1113_s17 + $0x8] sm:$0x3f]  ;;  %v800_v21 = vld [vmem:[%s1520_s1 + $0x98] sm:$0xff]  ;;  %402 = vmatpush.msra.mxu1 %v819_v17 }
  0x1a   : > { %278 = vmatpush.msra.mxu2 %v225_v7  ;;  %255 = vmatpush.msra.mxu0 %v785_v9  ;;  %v795_v20 = vld [vmem:[%s1520_s1 + $0x80] sm:$0xff]  ;;  %v811_v22 = vld [vmem:[%s1520_s1 + $0xe8] sm:$0xff]  ;;  %v818_v23 = vld [vmem:[%s1520_s1 + $0x110] sm:$0xff]  ;;  %p954_p3 = pnand %p953_p2, %p949_p13 }
  0x1b   : > { %340 = vmatpush.msra.mxu3 %v802_v10  ;;  %v794_v24 = vld [vmem:[%s1520_s1 + $0x78] sm:$0xff]  ;;  %v799_v25 = vld [vmem:[%s1520_s1 + $0x90] sm:$0xff]  ;;  %v810_v26 = vld [vmem:[%s1520_s1 + $0xe0] sm:$0xff]  ;;  %403 = vmatpush.msra.mxu1 %v818_v23 }
  0x1c   : > { %279 = vmatpush.msra.mxu2 %v224_v11  ;;  %256 = vmatpush.msra.mxu0 %v784_v12  ;;  %v798_v27 = vld [vmem:[%s1113_s17 + $0x9] sm:$0x3f]  ;;  %v793_v28 = vld [vmem:[%s1520_s1 + $0x70] sm:$0xff]  ;;  %v809_v30 = vld [vmem:[%s1520_s1 + $0xd8] sm:$0xff] }
  0x1d   : > { %341 = vmatpush.msra.mxu3 %v801_v13  ;;  %v817_v29 = vld [vmem:[%s1520_s1 + $0x108] sm:$0xff]  ;;  %v426_v31 = vld [vmem:[%s1521_s2 + $0x58] sm:$0xff]  ;;  %v816_v33 = vld [vmem:[%s1520_s1 + $0x100] sm:$0xff] }
  0x1e   : > { %280 = vmatpush.msra.mxu2 %v223_v14  ;;  %257 = vmatpush.msra.mxu0 %v783_v16  ;;  %v792_v32 = vld [vmem:[%s1520_s1 + $0x68] sm:$0xff]  ;;  %v808_v34 = vld [vmem:[%s1520_s1 + $0xd0] sm:$0xff]  ;;  %v791_v36 = vld [vmem:[%s1520_s1 + $0x60] sm:$0xff] }
  0x1f   : > { %790 = vmatmul.msk.f32.vlgmr.msra.gmra.mxu2 %vm238_vm0, %v222_v18  ;;  %789 = vmatmul.msk.f32.vlgmr.msra.gmra.mxu0 %vm238_vm0, %v782_v19  ;;  %v425_v35 = vld [vmem:[%s1521_s2 + $0x50] sm:$0xff]  ;;  %v815_v37 = vld [vmem:[%s1520_s1 + $0xf8] sm:$0xff]  ;;  %v285_v38 = vld [vmem:[%s1113_s17 + $0x1] sm:$0x3f] }
  0x20   : > { %306 = vmatpush.msrb.mxu2 %v796_v15  ;;  %342 = vmatpush.msra.mxu3 %v800_v21  ;;  %v807_v39 = vld [vmem:[%s1520_s1 + $0xc8] sm:$0xff]  ;;  %v814_v40 = vld [vmem:[%s1520_s1 + $0xf0] sm:$0xff]  ;;  %v832_v41 = vld [vmem:[%s1521_s2 + $0xb8] sm:$0xff] }
  0x21   : > { %370 = vmatpush.msrb.mxu0 %v811_v22  ;;  %404 = vmatpush.msra.mxu1 %v817_v29  ;;  %v806_v42 = vld [vmem:[%s1520_s1 + $0xc0] sm:$0xff]  ;;  %v813_v43 = vld [vmem:[%s1113_s17 + $0xa] sm:$0x3f]  ;;  %v831_v45 = vld [vmem:[%s1521_s2 + $0xb0] sm:$0xff] }
  0x22   : > { %307 = vmatpush.msrb.mxu2 %v795_v20  ;;  %343 = vmatpush.msra.mxu3 %v799_v25  ;;  %v349_v44 = vld [vmem:[%s1113_s17 + $0x2] sm:$0x3f]  ;;  %v424_v46 = vld [vmem:[%s1521_s2 + $0x48] sm:$0xff]  ;;  %v422_v50 = vld [vmem:[%s1521_s2 + $0x38] sm:$0xff] }
  0x23   : > { %371 = vmatpush.msrb.mxu0 %v810_v26  ;;  %805 = vmatmul.msk.f32.vlgmr.msra.gmra.mxu3 %vm238_vm0, %v798_v27  ;;  %v830_v47 = vld [vmem:[%s1521_s2 + $0xa8] sm:$0xff]  ;;  %v423_v48 = vld [vmem:[%s1521_s2 + $0x40] sm:$0xff]  ;;  %v828_v51 = vld [vmem:[%s1521_s2 + $0x98] sm:$0xff] }
  0x24   : > { %308 = vmatpush.msrb.mxu2 %v794_v24  ;;  %471 = vmatpush.msrb.mxu3 %v426_v31  ;;  %v829_v49 = vld [vmem:[%s1521_s2 + $0xa0] sm:$0xff]  ;;  %v421_v52 = vld [vmem:[%s1521_s2 + $0x30] sm:$0xff]  ;;  %v420_v54 = vld [vmem:[%s1521_s2 + $0x28] sm:$0xff] }
  0x25   : > { %372 = vmatpush.msrb.mxu0 %v809_v30  ;;  %405 = vmatpush.msra.mxu1 %v816_v33  ;;  %v827_v53 = vld [vmem:[%s1521_s2 + $0x90] sm:$0xff]  ;;  %v826_v55 = vld [vmem:[%s1521_s2 + $0x88] sm:$0xff]  ;;  %v419_v56 = vld [vmem:[%s1521_s2 + $0x20] sm:$0xff] }
  0x26   : > { %309 = vmatpush.msrb.mxu2 %v793_v28  ;;  %472 = vmatpush.msrb.mxu3 %v425_v35  ;;  %v825_v57 = vld [vmem:[%s1521_s2 + $0x80] sm:$0xff]  ;;  %v418_v58 = vld [vmem:[%s1521_s2 + $0x18] sm:$0xff]  ;;  %v417_v62 = vld [vmem:[%s1521_s2 + $0x10] sm:$0xff] }
  0x27   : > { %373 = vmatpush.msrb.mxu0 %v808_v34  ;;  %406 = vmatpush.msra.mxu1 %v815_v37  ;;  %v846_v59 = vld [vmem:[%s1521_s2 + $0x118] sm:$0xff]  ;;  %v845_v63 = vld [vmem:[%s1521_s2 + $0x110] sm:$0xff]  ;;  %v416_v2 = vld [vmem:[%s1521_s2 + $0x8] sm:$0xff] }
  0x28   : > { %310 = vmatpush.msrb.mxu2 %v792_v32  ;;  %473 = vmatpush.msrb.mxu3 %v424_v46  ;;  %v859_v60 = vld [vmem:[%s1521_s2 + $0x178] sm:$0xff]  ;;  %v858_v0 = vld [vmem:[%s1521_s2 + $0x170] sm:$0xff]  ;;  %v844_v3 = vld [vmem:[%s1521_s2 + $0x108] sm:$0xff] }
  0x29   : > { %374 = vmatpush.msrb.mxu0 %v807_v39  ;;  %407 = vmatpush.msra.mxu1 %v814_v40  ;;  %v824_v61 = vld [vmem:[%s1521_s2 + $0x78] sm:$0xff]  ;;  %v823_v1 = vld [vmem:[%s1521_s2 + $0x70] sm:$0xff]  ;;  %v857_v4 = vld [vmem:[%s1521_s2 + $0x168] sm:$0xff] }
  0x2a   : > { %311 = vmatpush.msrb.mxu2 %v791_v36  ;;  %820 = vmatmul.msk.f32.vlgmr.msra.gmra.mxu1 %vm238_vm0, %v813_v43  ;;  %v822_v5 = vld [vmem:[%s1521_s2 + $0x68] sm:$0xff]  ;;  %v415_v6 = vld [vmem:[%s1521_s2] sm:$0xff]  ;;  %v885_v9 = vld [vmem:[%s1521_s2 + $0x238] sm:$0xff] }
  0x2b   : > { %797 = vmatmul.msk.f32.vlgmr.msrb.gmra.mxu2 %vm238_vm0, %v285_v38  ;;  %375 = vmatpush.msrb.mxu0 %v806_v42  ;;  %v843_v7 = vld [vmem:[%s1521_s2 + $0x100] sm:$0xff]  ;;  %v842_v11 = vld [vmem:[%s1521_s2 + $0xf8] sm:$0xff]  ;;  %v884_v14 = vld [vmem:[%s1521_s2 + $0x230] sm:$0xff] }
  0x2c   : > { %449 = vmatpush.msra.mxu2 %v832_v41  ;;  %812 = vmatmul.msk.f32.vlgmr.msrb.gmra.mxu0 %vm238_vm0, %v349_v44  ;;  %v856_v8 = vld [vmem:[%s1521_s2 + $0x160] sm:$0xff]  ;;  %v855_v12 = vld [vmem:[%s1521_s2 + $0x158] sm:$0xff]  ;;  %v841_v15 = vld [vmem:[%s1521_s2 + $0xf0] sm:$0xff] }
  0x2d   : > { %474 = vmatpush.msrb.mxu3 %v423_v48  ;;  %507 = vmatpush.msra.mxu0 %v846_v59  ;;  %v821_v10 = vld [vmem:[%s1521_s2 + $0x60] sm:$0xff]  ;;  %v872_v13 = vld [vmem:[%s1521_s2 + $0x1d8] sm:$0xff]  ;;  %v854_v16 = vld [vmem:[%s1521_s2 + $0x150] sm:$0xff] }
  0x2e   : > { %450 = vmatpush.msra.mxu2 %v831_v45  ;;  %544 = vmatpush.msrb.mxu1 %v859_v60  ;;  %v871_v17 = vld [vmem:[%s1521_s2 + $0x1d0] sm:$0xff]  ;;  %v883_v18 = vld [vmem:[%s1521_s2 + $0x228] sm:$0xff]  ;;  %v882_v22 = vld [vmem:[%s1521_s2 + $0x220] sm:$0xff] }
  0x2f   : > { %475 = vmatpush.msrb.mxu3 %v422_v50  ;;  %508 = vmatpush.msra.mxu0 %v845_v63  ;;  %v840_v19 = vld [vmem:[%s1521_s2 + $0xe8] sm:$0xff]  ;;  %v839_v23 = vld [vmem:[%s1521_s2 + $0xe0] sm:$0xff]  ;;  %v881_v26 = vld [vmem:[%s1521_s2 + $0x218] sm:$0xff] }
  0x30   : > { %451 = vmatpush.msra.mxu2 %v830_v47  ;;  %545 = vmatpush.msrb.mxu1 %v858_v0  ;;  %v853_v20 = vld [vmem:[%s1521_s2 + $0x148] sm:$0xff]  ;;  %v852_v24 = vld [vmem:[%s1521_s2 + $0x140] sm:$0xff]  ;;  %v838_v27 = vld [vmem:[%s1521_s2 + $0xd8] sm:$0xff] }
  0x31   : > { %476 = vmatpush.msrb.mxu3 %v421_v52  ;;  %509 = vmatpush.msra.mxu0 %v844_v3  ;;  %v870_v21 = vld [vmem:[%s1521_s2 + $0x1c8] sm:$0xff]  ;;  %v869_v25 = vld [vmem:[%s1521_s2 + $0x1c0] sm:$0xff]  ;;  %v851_v28 = vld [vmem:[%s1521_s2 + $0x138] sm:$0xff] }
  0x32   : > { %452 = vmatpush.msra.mxu2 %v829_v49  ;;  %546 = vmatpush.msrb.mxu1 %v857_v4  ;;  %v868_v29 = vld [vmem:[%s1521_s2 + $0x1b8] sm:$0xff]  ;;  %v880_v30 = vld [vmem:[%s1521_s2 + $0x210] sm:$0xff]  ;;  %v879_v34 = vld [vmem:[%s1521_s2 + $0x208] sm:$0xff] }
  0x33   : > { %477 = vmatpush.msrb.mxu3 %v420_v54  ;;  %510 = vmatpush.msra.mxu0 %v843_v7  ;;  %v837_v31 = vld [vmem:[%s1521_s2 + $0xd0] sm:$0xff]  ;;  %v836_v35 = vld [vmem:[%s1521_s2 + $0xc8] sm:$0xff]  ;;  %v878_v38 = vld [vmem:[%s1521_s2 + $0x200] sm:$0xff] }
  0x34   : > { %453 = vmatpush.msra.mxu2 %v828_v51  ;;  %547 = vmatpush.msrb.mxu1 %v856_v8  ;;  %v850_v32 = vld [vmem:[%s1521_s2 + $0x130] sm:$0xff]  ;;  %v849_v36 = vld [vmem:[%s1521_s2 + $0x128] sm:$0xff]  ;;  %v835_v39 = vld [vmem:[%s1521_s2 + $0xc0] sm:$0xff] }
  0x35   : > { %478 = vmatpush.msrb.mxu3 %v419_v56  ;;  %511 = vmatpush.msra.mxu0 %v842_v11  ;;  %v867_v33 = vld [vmem:[%s1521_s2 + $0x1b0] sm:$0xff]  ;;  %v866_v37 = vld [vmem:[%s1521_s2 + $0x1a8] sm:$0xff]  ;;  %v848_v40 = vld [vmem:[%s1521_s2 + $0x120] sm:$0xff] }
  0x36   : > { %454 = vmatpush.msra.mxu2 %v827_v53  ;;  %548 = vmatpush.msrb.mxu1 %v855_v12  ;;  %v865_v41 = vld [vmem:[%s1521_s2 + $0x1a0] sm:$0xff]  ;;  %v877_v42 = vld [vmem:[%s1521_s2 + $0x1f8] sm:$0xff]  ;;  %v876_v44 = vld [vmem:[%s1521_s2 + $0x1f0] sm:$0xff] }
  0x37   : > { %479 = vmatpush.msrb.mxu3 %v418_v58  ;;  %512 = vmatpush.msra.mxu0 %v841_v15  ;;  %v864_v43 = vld [vmem:[%s1521_s2 + $0x198] sm:$0xff]  ;;  %v863_v45 = vld [vmem:[%s1521_s2 + $0x190] sm:$0xff]  ;;  %v875_v46 = vld [vmem:[%s1521_s2 + $0x1e8] sm:$0xff] }
  0x38   : > { %455 = vmatpush.msra.mxu2 %v826_v55  ;;  %549 = vmatpush.msrb.mxu1 %v854_v16  ;;  %v862_v47 = vld [vmem:[%s1521_s2 + $0x188] sm:$0xff]  ;;  %v874_v48 = vld [vmem:[%s1521_s2 + $0x1e0] sm:$0xff]  ;;  %v644_v4 = vld [vmem:[%s1522_s3 + $0x38] sm:$0xff] }
  0x39   : > { %480 = vmatpush.msrb.mxu3 %v417_v62  ;;  %513 = vmatpush.msra.mxu0 %v840_v19  ;;  %v861_v49 = vld [vmem:[%s1521_s2 + $0x180] sm:$0xff]  ;;  %v640_v8 = vld [vmem:[%s1522_s3 + $0x18] sm:$0xff] }
  0x3a   : > { %456 = vmatpush.msra.mxu2 %v825_v57  ;;  %550 = vmatpush.msrb.mxu1 %v853_v20  ;;  %v641_v7 = vld [vmem:[%s1522_s3 + $0x20] sm:$0xff]  ;;  %v685_v12 = vld [vmem:[%s1523_s4 + $0x78] sm:$0xff] }
  0x3b   : > { %481 = vmatpush.msrb.mxu3 %v416_v2  ;;  %514 = vmatpush.msra.mxu0 %v839_v23  ;;  %v637_v11 = vld [vmem:[%s1522_s3] sm:$0xff]  ;;  %v681_v16 = vld [vmem:[%s1523_s4 + $0x58] sm:$0xff] }
  0x3c   : > { %457 = vmatpush.msra.mxu2 %v824_v61  ;;  %551 = vmatpush.msrb.mxu1 %v852_v24  ;;  %v682_v15 = vld [vmem:[%s1523_s4 + $0x60] sm:$0xff]  ;;  %v677_v20 = vld [vmem:[%s1523_s4 + $0x38] sm:$0xff]  ;;  %v676_v24 = vld [vmem:[%s1523_s4 + $0x30] sm:$0xff] }
  0x3d   : > { %482 = vmatpush.msrb.mxu3 %v415_v6  ;;  %515 = vmatpush.msra.mxu0 %v838_v27  ;;  %v642_v6 = vld [vmem:[%s1522_s3 + $0x28] sm:$0xff]  ;;  %v678_v19 = vld [vmem:[%s1523_s4 + $0x40] sm:$0xff] }
  0x3e   : > { %458 = vmatpush.msra.mxu2 %v823_v1  ;;  %552 = vmatpush.msrb.mxu1 %v851_v28  ;;  %v675_v27 = vld [vmem:[%s1523_s4 + $0x28] sm:$0xff]  ;;  %v674_v28 = vld [vmem:[%s1523_s4 + $0x20] sm:$0xff] }
  0x3f   : > { %618 = vmatpush.msra.mxu3 %v885_v9  ;;  %516 = vmatpush.msra.mxu0 %v837_v31  ;;  %v639_v9 = vld [vmem:[%s1522_s3 + $0x10] sm:$0xff]  ;;  %v673_v31 = vld [vmem:[%s1523_s4 + $0x18] sm:$0xff] }
  0x40   : > { %459 = vmatpush.msra.mxu2 %v822_v5  ;;  %553 = vmatpush.msrb.mxu1 %v850_v32  ;;  %v643_v5 = vld [vmem:[%s1522_s3 + $0x30] sm:$0xff] }
  0x41   : > { %619 = vmatpush.msra.mxu3 %v884_v14  ;;  %517 = vmatpush.msra.mxu0 %v836_v35  ;;  %v683_v14 = vld [vmem:[%s1523_s4 + $0x68] sm:$0xff] }
  0x42   : > { %460 = vmatpush.msra.mxu2 %v821_v10  ;;  %554 = vmatpush.msrb.mxu1 %v849_v36  ;;  %v638_v10 = vld [vmem:[%s1522_s3 + $0x8] sm:$0xff] }
  0x43   : > { %620 = vmatpush.msra.mxu3 %v883_v18  ;;  %518 = vmatpush.msra.mxu0 %v835_v39  ;;  %v679_v18 = vld [vmem:[%s1523_s4 + $0x48] sm:$0xff] }
  0x44   : > { %581 = vmatpush.msrb.mxu2 %v872_v13  ;;  %555 = vmatpush.msrb.mxu1 %v848_v40  ;;  %v684_v13 = vld [vmem:[%s1523_s4 + $0x70] sm:$0xff]  ;;  %v671_v39 = vld [vmem:[%s1523_s4 + $0x8] sm:$0xff]  ;;  %v670_v40 = vld [vmem:[%s1523_s4] sm:$0xff] }
  0x45   : > { %621 = vmatpush.msra.mxu3 %v882_v22  ;;  %657 = vmatpush.msrb.mxu0 %v644_v4 }
  0x46   : > { %582 = vmatpush.msrb.mxu2 %v871_v17  ;;  %686 = vmatpush.msra.mxu1 %v685_v12  ;;  %v680_v17 = vld [vmem:[%s1523_s4 + $0x50] sm:$0xff] }
  0x47   : > { %622 = vmatpush.msra.mxu3 %v881_v26  ;;  %658 = vmatpush.msrb.mxu0 %v643_v5 }
  0x48   : > { %583 = vmatpush.msrb.mxu2 %v870_v21  ;;  %687 = vmatpush.msra.mxu1 %v684_v13 }
  0x49   : > { %623 = vmatpush.msra.mxu3 %v880_v30  ;;  %659 = vmatpush.msrb.mxu0 %v642_v6 }
  0x4a   : > { %584 = vmatpush.msrb.mxu2 %v869_v25  ;;  %688 = vmatpush.msra.mxu1 %v683_v14 }
  0x4b   : > { %624 = vmatpush.msra.mxu3 %v879_v34  ;;  %660 = vmatpush.msrb.mxu0 %v641_v7  ;;  %v672_v34 = vld [vmem:[%s1523_s4 + $0x10] sm:$0xff] }
  0x4c   : > { %585 = vmatpush.msrb.mxu2 %v868_v29  ;;  %689 = vmatpush.msra.mxu1 %v682_v15 }
  0x4d   : > { %625 = vmatpush.msra.mxu3 %v878_v38  ;;  %661 = vmatpush.msrb.mxu0 %v640_v8 }
  0x4e   : > { %586 = vmatpush.msrb.mxu2 %v867_v33  ;;  %690 = vmatpush.msra.mxu1 %v681_v16 }
  0x4f   : > { %626 = vmatpush.msra.mxu3 %v877_v42  ;;  %662 = vmatpush.msrb.mxu0 %v639_v9 }
  0x50   : > { %587 = vmatpush.msrb.mxu2 %v866_v37  ;;  %691 = vmatpush.msra.mxu1 %v680_v17 }
  0x51   : > { %627 = vmatpush.msra.mxu3 %v876_v44  ;;  %663 = vmatpush.msrb.mxu0 %v638_v10 }
  0x52   : > { %588 = vmatpush.msrb.mxu2 %v865_v41  ;;  %692 = vmatpush.msra.mxu1 %v679_v18 }
  0x53   : > { %628 = vmatpush.msra.mxu3 %v875_v46  ;;  %664 = vmatpush.msrb.mxu0 %v637_v11 }
  0x54   : > { %589 = vmatpush.msrb.mxu2 %v864_v43  ;;  %693 = vmatpush.msra.mxu1 %v678_v19 }
  0x55   : > { %629 = vmatpush.msra.mxu3 %v874_v48 }
  0x56   : > { %590 = vmatpush.msrb.mxu2 %v863_v45  ;;  %694 = vmatpush.msra.mxu1 %v677_v20 }
  0x58   : > { %591 = vmatpush.msrb.mxu2 %v862_v47  ;;  %695 = vmatpush.msra.mxu1 %v676_v24 }
  0x5a   : > { %592 = vmatpush.msrb.mxu2 %v861_v49  ;;  %696 = vmatpush.msra.mxu1 %v675_v27 }
  0x5c   : > { %697 = vmatpush.msra.mxu1 %v674_v28 }
  0x5e   : > { %698 = vmatpush.msra.mxu1 %v673_v31 }
  0x60   : > { %699 = vmatpush.msra.mxu1 %v672_v34 }
  0x62   : > { %700 = vmatpush.msra.mxu1 %v671_v39 }
  0x64   : > { %701 = vmatpush.msra.mxu1 %v670_v40 }
  0x9c   : > { %v259_v51 = vpop.f32.mrf.mxu0 }
  0xa2   : > { %v282_v50 = vpop.f32.mrf.mxu2 }
  0xa3   : > { %v283_v52 = vadd.f32 %v282_v50, %v259_v51 }
  0xa6   : > { %v345_v54 = vpop.f32.mrf.mxu3 }
  0xa7   : > { %v409_v58 = vpop.f32.mrf.mxu1 }
  0xa9   : > { %v377_v56 = vpop.f32.mrf.mxu0 }
  0xae   : > { %v313_v53 = vpop.f32.mrf.mxu2 }
  0xaf   : > { %v316_v55 = vadd.f32 %v313_v53, %v283_v52 }
  0xb1   : > { %v348_v57 = vadd.f32 %v345_v54, %v316_v55 }
  0xb3   : > { %v380_v59 = vadd.f32 %v377_v56, %v348_v57 }
  0xb5   : > { %v412_v60 = vadd.f32 %v409_v58, %v380_v59 }
  0xb7   : > { %v413_v61 = vmul.f32 0.25, %v412_v60 }
  0xb9   : > { %v414_v62 = vmax.f32 %v413_v61, 0.0 }
  0xbb   : > { %834 = vmatmul.msk.f32.vlgmr.msrb.gmra.mxu3 %vm442_vm1, %v414_v62  ;;  %v441_v63 = vrot.slane %v414_v62, 1  ;;  %v500_v0 = vrot.slane %v414_v62, 2  ;;  %v537_v1 = vrot.slane %v414_v62, 3  ;;  %v611_v2 = vrot.slane %v414_v62, 5 }
  0xbc   : > { %v574_v3 = vrot.slane %v414_v62, 4 }
  0xbd   : > { %833 = vmatmul.msk.f32.vlgmr.msra.gmra.mxu2 %vm442_vm1, %v441_v63  ;;  %847 = vmatmul.msk.f32.vlgmr.msra.gmra.mxu0 %vm442_vm1, %v500_v0 }
  0xbe   : > { %860 = vmatmul.msk.f32.vlgmr.msrb.gmra.mxu1 %vm442_vm1, %v537_v1 }
  0xc3   : > { %886 = vmatmul.msk.f32.vlgmr.msra.gmra.mxu3 %vm442_vm1, %v611_v2 }
  0xc5   : > { %873 = vmatmul.msk.f32.vlgmr.msrb.gmra.mxu2 %vm442_vm1, %v574_v3 }
 0x13a   : > { %v520_v25 = vpop.f32.mrf.mxu0 }
 0x13b   : > { %v557_v29 = vpop.f32.mrf.mxu1 }
 0x13e   : > { %v484_v21 = vpop.f32.mrf.mxu3 }
 0x140   : > { %v462_v22 = vpop.f32.mrf.mxu2 }
 0x141   : > { %v485_v23 = vadd.f32 %v484_v21, %v462_v22 }
 0x143   : > { %v523_v26 = vadd.f32 %v520_v25, %v485_v23 }
 0x145   : > { %v560_v30 = vadd.f32 %v557_v29, %v523_v26 }
 0x146   : > { %v631_v35 = vpop.f32.mrf.mxu3 }
 0x148   : > { %v594_v32 = vpop.f32.mrf.mxu2 }
 0x149   : > { %v597_v33 = vadd.f32 %v594_v32, %v560_v30 }
 0x14b   : > { %v634_v36 = vadd.f32 %v631_v35, %v597_v33 }
 0x14d   : > { %v635_v37 = vmul.f32 0.25, %v634_v36 }
 0x14f   : > { %v636_v38 = vmax.f32 %v635_v37, 0.0 }
 0x151   : > { %887 = vmatmul.msk.f32.vlgmr.msrb.gmra.mxu0 %vm645_vm2, %v636_v38 }
 0x1ce   : > { %v666_v41 = vpop.f32.mrf.mxu0 }
 0x1cf   : > { %v669_v42 = vmax.f32 %v666_v41, 0.0 }
 0x1d1   : > { %702 = vmatmul.f32.vlgmr.msra.gmra.mxu1 %v669_v42 }
 0x24e   : > { %v703_v43 = vpop.f32.mrf.mxu1 }
 0x24f   : > { %707 = vst.msk [vmem:[%s216_s6] sm:$0x1] %vm706_vm3, %v703_v43 }
 0x250   : > { %957 = shalt.err (!%p954_p3)
}
 0x251   : > { %891 = dma.vmem_to_hbm [thread:$0]  (%p1062_p5), %s720_s10, 16, %s722_s11, %s709_s12  }
 0x252 PF: > { %p897_p4 = scmp.ge.s32.totalorder %s992_s21, 2  ;;  %s733_s25 = sand.u32 1, %s980_s18  }
 0x253   : > { %s734_s26 = scalar_lea.sflag [#allocation3], %s733_s25 }
 0x254   : > { %p894_p7 = pnand %p897_p4, %p1066_p6 }
 0x256   : > { %p895_p8 = pneg %p894_p7 }
 0x258   : > { %975 = dma.done.wait (%p895_p8), %s734_s26, 16  }
 0x259   : > { %977 = vsyncadd (%p895_p8), %s734_s26, 4294967280  ;;  %p15_p9 = scmp.ge.s32.totalorder %s1049_s24, 4   ;;  %s1527_s18 = smov %s984_s19 }
 0x25a   : > { %s1528_s19 = smov %s988_s20  ;;  %s1529_s20 = smov %s1060_s27 }
 0x25b   : > { %s1530_s21 = smov %s1049_s24  ;;  %17 = sbr.rel (!%p15_p9) target bundleno = 3 (0x3), region = 86 }
 0x260   :  { %739 = vsyncpa [#allocation3], 1 }
 0x261   :  { %741 = vsyncpa [#allocation3 + $0x1], 1 }

</bundles_post_ra>
